<compile_context>
chip_gen: v7x
topology: tpu7x:2x2x1
jax: 0.10.0
libtpu: 0.0.40
codegen_flags: <defaults>
</compile_context>

<pallas_src>
import functools
import math

import jax
import jax.numpy as jnp
from jax.experimental import pallas as pl
from jax.experimental.pallas import tpu as pltpu


# ----------------------------------------------------------------------------
# Generation-dependent constants (queried once at import time).
# ----------------------------------------------------------------------------
def _query_vmem_capacity():
    try:
        return int(pltpu.get_tpu_info().vmem_capacity_bytes)
    except Exception:
        return None


_VMEM_CAP = _query_vmem_capacity()
_IS_V7X_LIKE = (_VMEM_CAP is not None) and (_VMEM_CAP <= 96 * 1024 * 1024)

# ~8 MiB per x / out block: 2x2 double-buffered = 32 MiB, safe even on v7x's
# 64 MiB VMEM, and large enough to amortize the ~0.35 us per-grid-step overhead.
_MAX_BLOCK_BYTES = 8 * 1024 * 1024
_VMEM_LIMIT = (48 * 1024 * 1024
               if (_VMEM_CAP is None or _IS_V7X_LIKE)
               else 64 * 1024 * 1024)
# Approx reciprocal (EUP slot) only where the kernel is VALU-bound (v7x).
_USE_APPROX_RECIP = _IS_V7X_LIKE


# ----------------------------------------------------------------------------
# Pallas kernel: group-wise rational function over a lane-dense (tile_n, tile_d) slab.
# ----------------------------------------------------------------------------
def _kat_rational_kernel(x_ref, a_ref, b_ref, o_ref, *, use_approx):
    # x_ref: (tile_n, tile_d) VMEM input slab
    # a_ref: (6,) SMEM scalars -- numerator coeffs, identical for every channel
    # b_ref: (4, tile_d) VMEM -- |denominator| coeffs, already per-lane expanded
    x = x_ref[...].astype(jnp.float32)
    ax = jnp.abs(x)
    b = b_ref[...]

    # Numerator P(x) via Horner with scalar (SMEM) coefficients.
    p = a_ref[5] * x + a_ref[4]
    p = p * x + a_ref[3]
    p = p * x + a_ref[2]
    p = p * x + a_ref[1]
    p = p * x + a_ref[0]

    # Denominator Q(x) = 1 + |b0||x| + |b1||x|^2 + |b2||x|^3 + |b3||x|^4 (Horner).
    q = b[3:4, :] * ax + b[2:3, :]
    q = q * ax + b[1:2, :]
    q = q * ax + b[0:1, :]
    q = q * ax + 1.0

    if use_approx:
        # v7x: VALU-bound regime -> move the divide to the (otherwise idle) EUP.
        y = p * pl.reciprocal(q, approx=True)
    else:
        # v5e/v6e: HBM-bound regime -> keep the exact f32 division (~1e-7).
        y = p / q
    o_ref[...] = y.astype(o_ref.dtype)


def _sublane_multiple(itemsize):
    # Native sublane tiling: (8,128) f32, (16,128) bf16, (32,128) int8/fp8.
    if itemsize >= 4:
        return 8
    if itemsize == 2:
        return 16
    return 32


def _choose_tiles(n_rows, n_lanes, itemsize, max_block_bytes):
    """Pick (tile_n, tile_d): ~max_block_bytes per block, (sublane,128)-legal."""
    sm = _sublane_multiple(itemsize)
    max_elems = max(sm * 128, max_block_bytes // itemsize)

    # Lane tile: keep the full width unless even an sm-row slab overflows the budget.
    if n_lanes % 128 == 0 and n_lanes * sm > max_elems:
        tile_d = max(128, ((max_elems // sm) // 128) * 128)
        tile_d = min(tile_d, n_lanes)
    else:
        tile_d = n_lanes                       # full extent -> always legal

    # Row tile: fill the byte budget (multiple of the native sublane count)...
    tile_n = max(sm, ((max_elems // tile_d) // sm) * sm)
    # ...but keep >= 2 row blocks when possible so v7x's two TensorCores can
    # both be sharded via the "parallel" grid axes (harmless on 1-TC chips).
    if n_rows > sm:
        half = -(-n_rows // 2)                 # cdiv(n_rows, 2)
        half = -(-half // sm) * sm             # round up to sublane multiple
        tile_n = min(tile_n, half)
    if n_rows <= tile_n:
        tile_n = n_rows                        # full extent -> always legal
    return tile_n, tile_d


def _rational_rows_jnp(x2, a, b):
    """Plain-jnp rational for the few remainder rows that cannot be lane-folded.

    x2: (r, D); a: (6,) numerator; b: (4, D) |denominator| per channel.
    """
    xf = x2.astype(jnp.float32)
    ax = jnp.abs(xf)
    p = a[5] * xf + a[4]
    p = p * xf + a[3]
    p = p * xf + a[2]
    p = p * xf + a[1]
    p = p * xf + a[0]
    q = b[3] * ax + b[2]
    q = q * ax + b[1]
    q = q * ax + b[0]
    q = q * ax + 1.0
    return (p / q).astype(x2.dtype)


@functools.partial(jax.jit, static_argnames=("num_groups",))
def kat_group_forward(x, weight_numerator, weight_denominator, num_groups):
    """Forward pass of KAT_Group.

    Args:
      x: (B, L, D) or (B, D) array. D must be divisible by num_groups.
      weight_numerator: (1, 6) numerator coefficients (shared across groups).
      weight_denominator: (num_groups, 4) denominator coefficients.
    Returns:
      Array with the same shape/dtype as x.
    """
    assert x.ndim in (2, 3), "Input tensor must be 3D (B, L, D) or 2D (B, D)."
    orig_shape = x.shape
    D = orig_shape[-1]
    assert D % num_groups == 0, "D must be divisible by num_groups"
    assert weight_numerator.size == 6, (
        "weight_numerator must hold exactly 6 group-shared coefficients (1, 6)")
    d_per_group = D // num_groups

    # --- glue (plain JAX, once per call, outside the per-tile hot path) --------
    a_vec = weight_numerator.reshape(-1).astype(jnp.float32)              # (6,) -> SMEM
    b_chan = jnp.abs(
        jnp.repeat(weight_denominator.astype(jnp.float32), d_per_group, axis=0)
    ).T                                                                    # (4, D)

    x2 = x.reshape(-1, D)                                                  # (N, D)
    N = x2.shape[0]

    # Fold rows into lanes so the lane (last) dim is 128-aligned when D is small/odd.
    # Rows that do not fit a full fold group are handled outside the kernel (tiny).
    if D % 128 == 0:
        fold, n_main = 1, N
    else:
        k = 128 // math.gcd(D, 128)
        n_main = (N // k) * k
        if n_main > 0:
            fold = k
        else:
            fold, n_main = 1, N    # tensor smaller than one fold group: single tiny block

    Nw = n_main // fold if fold > 1 else n_main
    Dw = D * fold
    xw = x2[:n_main].reshape(Nw, Dw)
    bw = jnp.tile(b_chan, (1, fold)) if fold > 1 else b_chan               # (4, Dw)

    tile_n, tile_d = _choose_tiles(Nw, Dw, x.dtype.itemsize, _MAX_BLOCK_BYTES)
    # Grid order (col_blocks, row_blocks): the |b| tile's block index (0, j)
    # is invariant over the innermost (row) loop. Ragged last blocks are masked.
    grid = (pl.cdiv(Dw, tile_d), pl.cdiv(Nw, tile_n))

    out_main = pl.pallas_call(
        functools.partial(_kat_rational_kernel, use_approx=_USE_APPROX_RECIP),
        out_shape=jax.ShapeDtypeStruct((Nw, Dw), x.dtype),
        grid=grid,
        in_specs=[
            pl.BlockSpec((tile_n, tile_d), lambda j, i: (i, j)),           # x slab
            pl.BlockSpec(memory_space=pltpu.MemorySpace.SMEM),             # (6,) numerator
            pl.BlockSpec((4, tile_d), lambda j, i: (0, j)),                # |b| table
        ],
        out_specs=pl.BlockSpec((tile_n, tile_d), lambda j, i: (i, j)),
        compiler_params=pltpu.CompilerParams(
            dimension_semantics=("parallel", "parallel"),
            vmem_limit_bytes=_VMEM_LIMIT,
        ),
    )(xw, a_vec, bw).reshape(n_main, D)

    if n_main < N:
        out_tail = _rational_rows_jnp(x2[n_main:], a_vec, b_chan)          # < fold rows
        out2 = jnp.concatenate([out_main, out_tail], axis=0)
    else:
        out2 = out_main
    return out2.reshape(orig_shape)


# ----------------------------------------------------------------------------
# Deterministic parameter init (in-script stand-in for init.json['gelu']).
# ----------------------------------------------------------------------------
def make_kat_group_params(num_groups=8):
    # TODO(synk): original module loads these from init.json; hard-coded GELU-like Padé(5,4) here.
    init_w_numerator = jnp.array(
        [[-0.0012423594, 0.5080497063, 0.4158636318,
          0.1302271869, 0.0243559001, 0.0029028395]], dtype=jnp.float32)    # (1, 6)
    init_w_denominator = jnp.array(
        [-0.0667501570, 0.1792764622, 0.0374668261, 0.0000000002],
        dtype=jnp.float32)                                                   # (4,)
    weight_denominator = jnp.tile(init_w_denominator[None, :], (num_groups, 1))  # (G, 4)
    # Deterministic per-group perturbation so the group-wise path is actually
    # exercised by the correctness checks (the module's trainable params would
    # likewise diverge per group after training).
    weight_denominator = weight_denominator * (
        1.0 + 0.05 * jnp.arange(num_groups, dtype=jnp.float32)[:, None])
    return init_w_numerator, weight_denominator


def _reference(x, wn, wd, num_groups):
    """Pure-JAX reference for correctness checking."""
    D = x.shape[-1]
    dpg = D // num_groups
    a = jnp.repeat(jnp.tile(wn, (num_groups, 1)), dpg, axis=0)   # (D, 6)
    b = jnp.abs(jnp.repeat(wd, dpg, axis=0))                     # (D, 4)
    xf = x.astype(jnp.float32)
    p = a[:, 5]
    for k in (4, 3, 2, 1, 0):
        p = p * xf + a[:, k]
    ax = jnp.abs(xf)
    q = b[:, 3]
    for k in (2, 1, 0):
        q = q * ax + b[:, k]
    q = q * ax + 1.0
    return (p / q).astype(x.dtype)


if __name__ == "__main__":
    key = jax.random.PRNGKey(0)
    k1, k2, k3 = jax.random.split(key, 3)

    num_groups = 8
    wn, wd = make_kat_group_params(num_groups)

    # Exact divide ~1e-7; v7x approx-reciprocal path ~1e-3 relative.
    tol = 3e-3 if _USE_APPROX_RECIP else 1e-5

    # Case 1: 3-D f32, small non-128 D (row->lane fold path, all rows fold).
    B, L, D = 2, 8, 32
    x3 = jax.random.normal(k1, (B, L, D), dtype=jnp.float32)
    out3 = jax.block_until_ready(kat_group_forward(x3, wn, wd, num_groups))
    ref3 = _reference(x3, wn, wd, num_groups)
    assert out3.shape == x3.shape and out3.dtype == x3.dtype
    assert jnp.max(jnp.abs(out3 - ref3)) < tol

    # Case 2: 2-D f32, non-128 D with ragged fold (kernel main rows + jnp tail rows).
    x2 = jax.random.normal(k2, (5, 64), dtype=jnp.float32)
    out2 = jax.block_until_ready(kat_group_forward(x2, wn, wd, num_groups))
    ref2 = _reference(x2, wn, wd, num_groups)
    assert out2.shape == x2.shape and out2.dtype == x2.dtype
    assert jnp.max(jnp.abs(out2 - ref2)) < tol

    # Case 3: bf16 input, 128-aligned D (dtype-aware sublane rounding, no fold).
    x16 = jax.random.normal(k3, (4, 8, 256), dtype=jnp.float32).astype(jnp.bfloat16)
    out16 = jax.block_until_ready(kat_group_forward(x16, wn, wd, num_groups))
    ref16 = _reference(x16, wn, wd, num_groups)
    assert out16.shape == x16.shape and out16.dtype == x16.dtype
    assert jnp.max(jnp.abs(out16.astype(jnp.float32)
                           - ref16.astype(jnp.float32))) < 3e-2

    print("KERNEL_OK")
</pallas_src>

<mosaic_0001>
module attributes {stable_mosaic.version = 11 : i64} {
  func.func @_kat_rational_kernel(%arg0: i32, %arg1: i32, %arg2: memref<4x128xf32, #tpu.memory_space<vmem>>, %arg3: memref<6xf32, #tpu.memory_space<smem>>, %arg4: memref<4x128xf32, #tpu.memory_space<vmem>>, %arg5: memref<4x128xf32, #tpu.memory_space<vmem>>) attributes {dimension_semantics = [#tpu.dimension_semantics<parallel>, #tpu.dimension_semantics<parallel>], iteration_bounds = array<i64: 1, 1>, scalar_prefetch = 0 : i64, scratch_operands = 0 : i64, tpu.core_type = #tpu.core_type<tc>, window_params = [{transform_indices = @transform_0, window_bounds = array<i64: 4, 128>}, {transform_indices = @transform_1, window_bounds = array<i64: 6>}, {transform_indices = @transform_2, window_bounds = array<i64: 4, 128>}, {transform_indices = @transform_3, window_bounds = array<i64: 4, 128>}]} {
    %c0 = arith.constant 0 : index
    %c0_0 = arith.constant 0 : index
    %0 = vector.load %arg2[%c0, %c0_0] : memref<4x128xf32, #tpu.memory_space<vmem>>, vector<4x128xf32>
    %1 = math.absf %0 : vector<4x128xf32>
    %c0_1 = arith.constant 0 : index
    %c0_2 = arith.constant 0 : index
    %2 = vector.load %arg4[%c0_1, %c0_2] : memref<4x128xf32, #tpu.memory_space<vmem>>, vector<4x128xf32>
    %c5 = arith.constant 5 : index
    %3 = memref.load %arg3[%c5] : memref<6xf32, #tpu.memory_space<smem>>
    %4 = vector.broadcast %3 : f32 to vector<4x128xf32>
    %5 = arith.mulf %4, %0 : vector<4x128xf32>
    %c4 = arith.constant 4 : index
    %6 = memref.load %arg3[%c4] : memref<6xf32, #tpu.memory_space<smem>>
    %7 = vector.broadcast %6 : f32 to vector<4x128xf32>
    %8 = arith.addf %5, %7 : vector<4x128xf32>
    %9 = arith.mulf %8, %0 : vector<4x128xf32>
    %c3 = arith.constant 3 : index
    %10 = memref.load %arg3[%c3] : memref<6xf32, #tpu.memory_space<smem>>
    %11 = vector.broadcast %10 : f32 to vector<4x128xf32>
    %12 = arith.addf %9, %11 : vector<4x128xf32>
    %13 = arith.mulf %12, %0 : vector<4x128xf32>
    %c2 = arith.constant 2 : index
    %14 = memref.load %arg3[%c2] : memref<6xf32, #tpu.memory_space<smem>>
    %15 = vector.broadcast %14 : f32 to vector<4x128xf32>
    %16 = arith.addf %13, %15 : vector<4x128xf32>
    %17 = arith.mulf %16, %0 : vector<4x128xf32>
    %c1 = arith.constant 1 : index
    %18 = memref.load %arg3[%c1] : memref<6xf32, #tpu.memory_space<smem>>
    %19 = vector.broadcast %18 : f32 to vector<4x128xf32>
    %20 = arith.addf %17, %19 : vector<4x128xf32>
    %21 = arith.mulf %20, %0 : vector<4x128xf32>
    %c0_3 = arith.constant 0 : index
    %22 = memref.load %arg3[%c0_3] : memref<6xf32, #tpu.memory_space<smem>>
    %23 = vector.broadcast %22 : f32 to vector<4x128xf32>
    %24 = arith.addf %21, %23 : vector<4x128xf32>
    %25 = vector.extract_strided_slice %2 {offsets = [3, 0], sizes = [1, 128], strides = [1, 1]} : vector<4x128xf32> to vector<1x128xf32>
    %26 = vector.broadcast %25 : vector<1x128xf32> to vector<4x128xf32>
    %27 = arith.mulf %26, %1 : vector<4x128xf32>
    %28 = vector.extract_strided_slice %2 {offsets = [2, 0], sizes = [1, 128], strides = [1, 1]} : vector<4x128xf32> to vector<1x128xf32>
    %29 = vector.broadcast %28 : vector<1x128xf32> to vector<4x128xf32>
    %30 = arith.addf %27, %29 : vector<4x128xf32>
    %31 = arith.mulf %30, %1 : vector<4x128xf32>
    %32 = vector.extract_strided_slice %2 {offsets = [1, 0], sizes = [1, 128], strides = [1, 1]} : vector<4x128xf32> to vector<1x128xf32>
    %33 = vector.broadcast %32 : vector<1x128xf32> to vector<4x128xf32>
    %34 = arith.addf %31, %33 : vector<4x128xf32>
    %35 = arith.mulf %34, %1 : vector<4x128xf32>
    %36 = vector.extract_strided_slice %2 {offsets = [0, 0], sizes = [1, 128], strides = [1, 1]} : vector<4x128xf32> to vector<1x128xf32>
    %37 = vector.broadcast %36 : vector<1x128xf32> to vector<4x128xf32>
    %38 = arith.addf %35, %37 : vector<4x128xf32>
    %39 = arith.mulf %38, %1 : vector<4x128xf32>
    %cst = arith.constant 1.000000e+00 : f32
    %40 = vector.broadcast %cst : f32 to vector<4x128xf32>
    %41 = arith.addf %39, %40 : vector<4x128xf32>
    %42 = arith.divf %24, %41 : vector<4x128xf32>
    %c0_4 = arith.constant 0 : index
    %c0_5 = arith.constant 0 : index
    %43 = vector.load %arg5[%c0_4, %c0_5] : memref<4x128xf32, #tpu.memory_space<vmem>>, vector<4x128xf32>
    tpu.vector_store %arg5[%c0_4, %c0_5], %42 {strides = array<i32>} : memref<4x128xf32, #tpu.memory_space<vmem>>, vector<4x128xf32>,
    return
  }
  func.func @transform_0(%arg0: i32, %arg1: i32) -> (i32, i32) {
    %c0_i32 = arith.constant 0 : i32
    return %arg1, %arg0 : i32, i32
  }
  func.func @transform_1(%arg0: i32, %arg1: i32) -> i32 {
    %c0_i32 = arith.constant 0 : i32
    %c0_i32_0 = arith.constant 0 : i32
    return %c0_i32 : i32
  }
  func.func @transform_2(%arg0: i32, %arg1: i32) -> (i32, i32) {
    %c0_i32 = arith.constant 0 : i32
    %c0_i32_0 = arith.constant 0 : i32
    return %c0_i32, %arg0 : i32, i32
  }
  func.func @transform_3(%arg0: i32, %arg1: i32) -> (i32, i32) {
    %c0_i32 = arith.constant 0 : i32
    return %arg1, %arg0 : i32, i32
  }
}

</mosaic_0001>

<bundles_post_ra>
// kernel: tile.9
= control target key start
LH: loop header
LB: loop body
LE: loop exit
PB: predicated region body
PF: predicated region fallthrough
CT: control target
= control target key end

     0   :  { %vm21_vm0 = vcmask 261120   ;;  %s56_s14 = smov 32   ;;  %s57_s15 = smov 64   ;;  %vm27_vm1 = vcmask 1048320   ;;  %vm33_vm2 = vcmask 785920   ;;  %vm39_vm3 = vcmask 523520   ;;  %s83_s0 = inlined_call_operand.vmem [shape: f32[4,4,32], index: 0, kind: input, shape index: {}]   ;;  %s84_s1 = inlined_call_operand.vmem [shape: f32[4,128], index: 1, kind: output, shape index: {}]  }
   0x1   :  { %v49_v0 = vld [vmem:[%s83_s0 + $0xc] sm:$0xf]  ;;  %v50_v1 = vld [vmem:[%s83_s0 + $0x8] sm:$0xf]  ;;  %v51_v2 = vld [vmem:[%s83_s0 + $0x4] sm:$0xf] }
   0x2   :  { %8 = vst [vmem:[#allocation1 + $0x18] sm:$0xf] %v49_v0  ;;  %13 = vst [vmem:[#allocation1 + $0x10] sm:$0xf] %v50_v1  ;;  %v18_v3 = vld [vmem:[%s83_s0] sm:$0xf] }
   0x3   :  { %17 = vst [vmem:[#allocation1 + $0x8] sm:$0xf] %v51_v2  ;;  %19 = vst [vmem:[#allocation1] sm:$0xf] %v18_v3  ;;  %s55_s0 = smov 96  }
   0xa   :  { %v24_v4 = vld [vmem:[#allocation1 + $0x3] ss:$8 sm:$0xf]   ;;  %v36_v5 = vld [vmem:[#allocation1 + $0x1] ss:$8 sm:$0xf]  }
   0xb   :  { %25 = vrot.lane.b32.xlu0 %v24_v4, %s55_s0  ;;  %v20_v6 = vld [vmem:[#allocation1] ss:$8 sm:$0xf]   ;;  %v30_v7 = vld [vmem:[#allocation1 + $0x2] ss:$8 sm:$0xf]   ;;  %37 = vrot.lane.b32.xlu1 %v36_v5, %s56_s14 }
   0xc   :  { %22 = vst.msk [vmem:[#allocation0] sm:$0xf] %vm21_vm0, %v20_v6  }
   0xf   :  { %31 = vrot.lane.b32.xlu0 %v30_v7, %s57_s15 }
  0x7d   :  { %v26_v8 = vpop.permute.xlu0 %25   ;;  %v38_v9 = vpop.permute.xlu1 %37  }
  0x7e   :  { %28 = vst.msk [vmem:[#allocation0] sm:$0xf] %vm27_vm1, %v26_v8  }
  0x81   :  { %v32_v10 = vpop.permute.xlu0 %31  }
  0x82   :  { %34 = vst.msk [vmem:[#allocation0] sm:$0xf] %vm33_vm2, %v32_v10  }
  0x83   :  { %40 = vst.msk [vmem:[#allocation0] sm:$0xf] %vm39_vm3, %v38_v9  }
  0x8a   :  { %v44_v11 = vld [vmem:[#allocation0] sm:$0xf] }
  0x8b   :  { %46 = vst [vmem:[%s84_s1] sm:$0xf] %v44_v11 }

// kernel: kat_group_forward.1
= control target key start
LH: loop header
LB: loop body
LE: loop exit
PB: predicated region body
PF: predicated region fallthrough
CT: control target
= control target key end

     0   :  { %8 = vsyncpa [#allocation3], 0  ;;  %s139_s0 = inlined_call_operand.vmem [shape: f32[4,128], index: 0, kind: input, shape index: {}]   ;;  %s140_s1 = inlined_call_operand.vmem [shape: f32[6], index: 1, kind: input, shape index: {}]   ;;  %s141_s2 = inlined_call_operand.vmem [shape: f32[4,128], index: 2, kind: input, shape index: {}]   ;;  %s142_s3 = inlined_call_operand.vmem [shape: f32[4,128], index: 3, kind: output, shape index: {}]  }
   0x1   :  { %s17_s14 = sshll.u32 %s140_s1, 4  ;;  %s18_s14 = int_to_ptr.vmem [resolvable:$true] %s17_s14 }
   0x2   :  { %s92_s15 = scalar_lea.vmem %s18_s14, 16  ;;  %p97_p1 = scmp.lt.s32.totalorder %s18_s14, %s18_s14 }
   0x3   :  { %p93_p0 = scmp.ne.s32.totalorder %s18_s14, %s92_s15  ;;  %p98_p2 = scmp.lt.s32.totalorder %s92_s15, %s92_s15 }
   0x5   :  { %p99_p3 = por %p98_p2, %p97_p1 }
   0x7   :  { %p100_p4 = pnand %p99_p3, %p93_p0 }
   0x9   :  { %103 = shalt.err (!%p100_p4)
}
   0xa   :  { %s106_s16 = smov [#allocation2]  }
   0xb   :  { %20 = dma.vmem_to_smem %s18_s14, 16, %s106_s16, [#allocation3]  }
   0xc   :  { %104 = dma.done.wait [#allocation3], 16  }
   0xd   :  { %105 = vsyncadd [#allocation3], 4294967280 }
   0xe   :  { %26 = sfence }
   0xf   :  { %s84_s17 = sld [smem:[#allocation2 + $0x5]]  ;;  %v52_v0 = vlaneseq  ;;  %v27_v1 = vld [vmem:[%s139_s0] sm:$0xf]  ;;  %s85_s1 = sld [smem:[#allocation2 + $0x4]] }
  0x10   :  { %s86_s20 = sld [smem:[#allocation2 + $0x3]]  ;;  %v29_v3 = vld [vmem:[%s141_s2] sm:$0xf]  ;;  %v28_v4 = vand.u32 2147483647, %v27_v1  ;;  %s87_s23 = sld [smem:[#allocation2 + $0x2]] }
  0x11   :  { %v53_v2 = vshrl.u32 %v52_v0, 7  ;;  %s88_s0 = sld [smem:[#allocation2 + $0x1]]  ;;  %s49_s2 = sld [smem:[#allocation2]] }
  0x13   :  { %v54_v5 = vsub.s32 3, %v53_v2  ;;  %v59_v6 = vsub.s32 2, %v53_v2  ;;  %v65_v10 = vsub.s32 1, %v53_v2  ;;  %v71_v18 = vsub.s32 0, %v53_v2 }
  0x15   :  { %v31_v7 = vstv %s84_s17  ;;  %v55_v8 = vrot.slane %v29_v3, %v54_v5  ;;  %v60_v9 = vrot.slane %v29_v3, %v59_v6  ;;  %v34_v12 = vstv %s85_s1 }
  0x16   :  { %v32_v11 = vmul.f32 %v31_v7, %v27_v1  ;;  %v38_v15 = vstv %s86_s20  ;;  %v66_v17 = vrot.slane %v29_v3, %v65_v10  ;;  %v42_v22 = vstv %s87_s23 }
  0x17   :  { %v56_v13 = vmul.f32 %v55_v8, %v28_v4  ;;  %v72_v24 = vrot.slane %v29_v3, %v71_v18  ;;  %v46_v30 = vstv %s88_s0  ;;  %v50_v35 = vstv %s49_s2 }
  0x18   :  { %v35_v14 = vadd.f32 %v34_v12, %v32_v11 }
  0x19   :  { %v61_v16 = vadd.f32 %v60_v9, %v56_v13 }
  0x1a   :  { %v36_v19 = vmul.f32 %v35_v14, %v27_v1 }
  0x1b   :  { %v62_v20 = vmul.f32 %v61_v16, %v28_v4 }
  0x1c   :  { %v39_v21 = vadd.f32 %v38_v15, %v36_v19 }
  0x1d   :  { %v67_v23 = vadd.f32 %v66_v17, %v62_v20 }
  0x1e   :  { %v40_v25 = vmul.f32 %v39_v21, %v27_v1 }
  0x1f   :  { %v68_v26 = vmul.f32 %v67_v23, %v28_v4 }
  0x20   :  { %v43_v27 = vadd.f32 %v42_v22, %v40_v25 }
  0x21   :  { %v73_v28 = vadd.f32 %v72_v24, %v68_v26 }
  0x22   :  { %v44_v29 = vmul.f32 %v43_v27, %v27_v1 }
  0x23   :  { %v74_v31 = vmul.f32 %v73_v28, %v28_v4 }
  0x24   :  { %v47_v33 = vadd.f32 %v46_v30, %v44_v29 }
  0x25   :  { %v75_v32 = vadd.f32 1.0, %v74_v31 }
  0x26   :  { %v48_v34 = vmul.f32 %v47_v33, %v27_v1 }
  0x27   :  { %90 = vrcp.f32 %v75_v32 }
  0x28   :  { %v51_v36 = vadd.f32 %v50_v35, %v48_v34 }
  0x31   :  { %v91_v37 = vpop.eup %90 }
  0x32   :  { %v77_v38 = vmul.f32 %v91_v37, %v51_v36 }
  0x34   :  { %78 = vst [vmem:[%s142_s3] sm:$0xf] %v77_v38 }
  0x35   :  { %83 = vsyncpa [#allocation3], 1 }

</bundles_post_ra>
